<compile_context>
chip_gen: v7x
topology: tpu7x:2x2x1
jax: 0.10.0
libtpu: 0.0.40
codegen_flags: <defaults>
</compile_context>

<pallas_src>
import jax
import jax.numpy as jnp
from jax.experimental import pallas as pl
from jax.experimental.pallas import tpu as pltpu


# ---------------------------------------------------------------------------
# Phase 1: graph conv + weight matmul + bias + L2 normalize + BN partial sums
# ---------------------------------------------------------------------------
def gcn_phase1_kernel(lens_ref,                          # scalar prefetch (SMEM)
                      adj_ref, x_ref, w_ref, bias_ref,   # inputs
                      y_ref, psum_ref, psumsq_ref):      # outputs
    b = pl.program_id(0)
    i = pl.program_id(1)
    _, tn, d_out = y_ref.shape

    # BN-stat accumulators live across the N-tile ("arbitrary") axis.
    @pl.when(i == 0)
    def _init():
        psum_ref[...] = jnp.zeros_like(psum_ref)
        psumsq_ref[...] = jnp.zeros_like(psumsq_ref)

    adj = adj_ref[0]          # (tn, N_pad)      bf16   (already includes +I)
    x = x_ref[0]              # (N_pad, d_in)    bf16
    w = w_ref[...]            # (d_in, d_out)    bf16
    bias = bias_ref[...]      # (1, d_out)       f32

    # (adj + I) @ x  -> f32 accumulation on the MXU
    h = jnp.dot(adj, x, preferred_element_type=jnp.float32)
    # h @ W + bias   -> flat 2-D matmul per tile
    y = jnp.dot(h.astype(w.dtype), w, preferred_element_type=jnp.float32) + bias

    # F.normalize(y, p=2, dim=-1): y / max(||y||, 1e-12)  ==  y * rsqrt(max(ss, 1e-24))
    ss = jnp.sum(y * y, axis=-1, keepdims=True)
    y = y * jax.lax.rsqrt(jnp.maximum(ss, 1e-24))

    y_ref[0] = y

    # Masked partial sums for batch statistics (mask rebuilt from SMEM lengths).
    row = jax.lax.broadcasted_iota(jnp.int32, (tn, 1), 0) + i * tn
    mask = (row < lens_ref[b]).astype(jnp.float32)                # (tn, 1)
    ym = y * mask
    # Sublane-group split keeps the reduce sublane-strided (cheap on the XLU).
    ym3 = ym.reshape(tn // 8, 8, d_out)
    psum_ref[0] = psum_ref[0] + jnp.sum(ym3, axis=0)              # (8, d_out)
    psumsq_ref[0] = psumsq_ref[0] + jnp.sum(ym3 * ym3, axis=0)    # (8, d_out)


# ---------------------------------------------------------------------------
# Phase 2: BatchNorm apply (pre-folded scale/shift) + mask + ReLU
# ---------------------------------------------------------------------------
def gcn_phase2_kernel(lens_ref, y_ref, scale_ref, shift_ref, o_ref):
    b = pl.program_id(0)
    i = pl.program_id(1)
    _, tn, _ = y_ref.shape

    y = y_ref[0]                                                  # (tn, d_out) f32
    row = jax.lax.broadcasted_iota(jnp.int32, (tn, 1), 0) + i * tn
    mask = (row < lens_ref[b]).astype(jnp.float32)                # (tn, 1)
    yb = (y * scale_ref[...] + shift_ref[...]) * mask
    o_ref[0] = jnp.maximum(yb, 0.0)


def _round_up(v, m):
    return (v + m - 1) // m * m


def _pick_tile(n_pad, d_in_pad, d_out_pad, vmem_budget=40 * 1024 * 1024):
    """Largest N-tile (multiple of 128, divides n_pad) whose working set fits VMEM."""
    best = 128
    for cand in (1024, 512, 256, 128):
        if n_pad % cand != 0:
            continue
        # double-buffered input/output blocks for phase 1 (bf16 in, f32 y out)
        bytes_needed = (
            2 * (cand * n_pad * 2)              # adj tile, bf16
            + 2 * (n_pad * d_in_pad * 2)        # x block, bf16
            + 2 * (d_in_pad * d_out_pad * 2)    # weight, bf16
            + 2 * (cand * d_out_pad * 4)        # y output tile, f32
            + 4 * (8 * d_out_pad * 4)           # psum / psumsq accumulators
        )
        if bytes_needed <= vmem_budget:
            return cand
    return best


@jax.jit
def gcn_forward(x, adj, mask, weight, bias, gamma, beta):
    """x: (B,N,d_in), adj: (B,N,N), mask: (B,N) with valid nodes front-contiguous."""
    B, N, d_in = x.shape
    d_out = weight.shape[1]

    # Per-batch valid lengths (== mask.sum(1), as the PyTorch BN gather assumes).
    lengths = jnp.sum(mask.astype(jnp.float32), axis=1).astype(jnp.int32)

    # Lane-dense padding: N / d_in / d_out up to multiples of 128.
    N_pad = _round_up(N, 128)
    d_in_pad = _round_up(d_in, 128)
    d_out_pad = _round_up(d_out, 128)
    tn = _pick_tile(N_pad, d_in_pad, d_out_pad)
    nt = N_pad // tn

    # Fuse self-loop into adj, zero-pad everything, cast matmul operands to bf16.
    adj_self = adj + jnp.eye(N, dtype=adj.dtype)[None]
    if N_pad == N:
        adj_bf = adj_self.astype(jnp.bfloat16)
    else:
        adj_bf = (jnp.zeros((B, N_pad, N_pad), jnp.float32)
                  .at[:, :N, :N].set(adj_self).astype(jnp.bfloat16))
    if N_pad == N and d_in_pad == d_in:
        x_bf = x.astype(jnp.bfloat16)
    else:
        x_bf = (jnp.zeros((B, N_pad, d_in_pad), jnp.float32)
                .at[:, :N, :d_in].set(x).astype(jnp.bfloat16))
    w_bf = (jnp.zeros((d_in_pad, d_out_pad), jnp.float32)
            .at[:d_in, :d_out].set(weight).astype(jnp.bfloat16))
    b_p = jnp.zeros((1, d_out_pad), jnp.float32).at[0, :d_out].set(bias)

    # ---------------- phase 1 ----------------
    y_pad, psum, psumsq = pl.pallas_call(
        gcn_phase1_kernel,
        out_shape=(
            jax.ShapeDtypeStruct((B, N_pad, d_out_pad), jnp.float32),
            jax.ShapeDtypeStruct((B, 8, d_out_pad), jnp.float32),
            jax.ShapeDtypeStruct((B, 8, d_out_pad), jnp.float32),
        ),
        grid_spec=pltpu.PrefetchScalarGridSpec(
            num_scalar_prefetch=1,
            grid=(B, nt),
            in_specs=[
                pl.BlockSpec((1, tn, N_pad), lambda b, i, lens: (b, i, 0)),
                pl.BlockSpec((1, N_pad, d_in_pad), lambda b, i, lens: (b, 0, 0)),
                pl.BlockSpec((d_in_pad, d_out_pad), lambda b, i, lens: (0, 0)),
                pl.BlockSpec((1, d_out_pad), lambda b, i, lens: (0, 0)),
            ],
            out_specs=[
                pl.BlockSpec((1, tn, d_out_pad), lambda b, i, lens: (b, i, 0)),
                pl.BlockSpec((1, 8, d_out_pad), lambda b, i, lens: (b, 0, 0)),
                pl.BlockSpec((1, 8, d_out_pad), lambda b, i, lens: (b, 0, 0)),
            ],
        ),
        compiler_params=pltpu.CompilerParams(
            dimension_semantics=("parallel", "arbitrary"),
            vmem_limit_bytes=48 * 1024 * 1024,
        ),
    )(lengths, adj_bf, x_bf, w_bf, b_p)

    # ------- tiny BN-stat finalization (d_out-sized vectors, plain XLA) -------
    count = jnp.maximum(jnp.sum(lengths).astype(jnp.float32), 1.0)
    total = jnp.sum(psum, axis=(0, 1))                       # (d_out_pad,)
    total_sq = jnp.sum(psumsq, axis=(0, 1))                  # (d_out_pad,)
    mean = total / count
    var = jnp.maximum(total_sq / count - mean * mean, 0.0)   # biased variance
    inv_std = jax.lax.rsqrt(var + 1e-5)
    gamma_p = jnp.zeros((d_out_pad,), jnp.float32).at[:d_out].set(gamma)
    beta_p = jnp.zeros((d_out_pad,), jnp.float32).at[:d_out].set(beta)
    scale = (gamma_p * inv_std).reshape(1, d_out_pad)
    shift = (beta_p - mean * gamma_p * inv_std).reshape(1, d_out_pad)

    # ---------------- phase 2 ----------------
    out_pad = pl.pallas_call(
        gcn_phase2_kernel,
        out_shape=jax.ShapeDtypeStruct((B, N_pad, d_out_pad), jnp.float32),
        grid_spec=pltpu.PrefetchScalarGridSpec(
            num_scalar_prefetch=1,
            grid=(B, nt),
            in_specs=[
                pl.BlockSpec((1, tn, d_out_pad), lambda b, i, lens: (b, i, 0)),
                pl.BlockSpec((1, d_out_pad), lambda b, i, lens: (0, 0)),
                pl.BlockSpec((1, d_out_pad), lambda b, i, lens: (0, 0)),
            ],
            out_specs=pl.BlockSpec((1, tn, d_out_pad), lambda b, i, lens: (b, i, 0)),
        ),
        compiler_params=pltpu.CompilerParams(
            dimension_semantics=("parallel", "parallel"),
        ),
    )(lengths, y_pad, scale, shift)

    # TODO(synk): running-mean/var updates of BatchNorm1d are intentionally not
    # reproduced (they do not affect the training-mode forward value).
    return out_pad[:, :N, :d_out]


if __name__ == "__main__":
    B, N, d_in, d_out = 2, 16, 32, 32

    key = jax.random.PRNGKey(0)
    k_x, k_adj, k_w = jax.random.split(key, 3)

    x = jax.random.normal(k_x, (B, N, d_in), dtype=jnp.float32)
    adj = jax.random.uniform(k_adj, (B, N, N), dtype=jnp.float32)

    # valid nodes are front-contiguous per batch element (as the PyTorch BN assumes)
    lengths = jnp.array([12, 16], dtype=jnp.int32)
    mask = (jnp.arange(N)[None, :] < lengths[:, None]).astype(jnp.float32)

    # parameters matching the module's __init__
    xavier_std = (2.0 / (d_in + d_out)) ** 0.5          # xavier_normal_, gain=1
    weight = xavier_std * jax.random.normal(k_w, (d_in, d_out), dtype=jnp.float32)
    bias = jnp.zeros((d_out,), dtype=jnp.float32)
    gamma = jnp.ones((d_out,), dtype=jnp.float32)       # BatchNorm1d weight
    beta = jnp.zeros((d_out,), dtype=jnp.float32)       # BatchNorm1d bias

    out = gcn_forward(x, adj, mask, weight, bias, gamma, beta)
    out = jax.block_until_ready(out)

    assert out.shape == (B, N, d_out)
    assert bool(jnp.all(jnp.isfinite(out)))
    print("KERNEL_OK")
</pallas_src>

<mosaic_0001>
module attributes {stable_mosaic.version = 11 : i64} {
  func.func @gcn_phase1_kernel(%arg0: i32, %arg1: i32, %arg2: memref<2xi32, #tpu.memory_space<smem>>, %arg3: memref<1x128x128xbf16, #tpu.memory_space<vmem>>, %arg4: memref<1x128x128xbf16, #tpu.memory_space<vmem>>, %arg5: memref<128x128xbf16, #tpu.memory_space<vmem>>, %arg6: memref<1x128xf32, #tpu.memory_space<vmem>>, %arg7: memref<1x128x128xf32, #tpu.memory_space<vmem>>, %arg8: memref<1x8x128xf32, #tpu.memory_space<vmem>>, %arg9: memref<1x8x128xf32, #tpu.memory_space<vmem>>) attributes {dimension_semantics = [#tpu.dimension_semantics<parallel>, #tpu.dimension_semantics<arbitrary>], iteration_bounds = array<i64: 2, 1>, scalar_prefetch = 1 : i64, scratch_operands = 0 : i64, tpu.core_type = #tpu.core_type<tc>, window_params = [{transform_indices = @transform_0, window_bounds = array<i64: 1, 128, 128>}, {transform_indices = @transform_1, window_bounds = array<i64: 1, 128, 128>}, {pipeline_mode = #tpu.pipeline_mode<synchronous>, transform_indices = @transform_2, window_bounds = array<i64: 128, 128>}, {pipeline_mode = #tpu.pipeline_mode<synchronous>, transform_indices = @transform_3, window_bounds = array<i64: 1, 128>}, {transform_indices = @transform_4, window_bounds = array<i64: 1, 128, 128>}, {transform_indices = @transform_5, window_bounds = array<i64: 1, 8, 128>}, {transform_indices = @transform_6, window_bounds = array<i64: 1, 8, 128>}]} {
    %c0_i32 = arith.constant 0 : i32
    %0 = arith.cmpi eq, %arg1, %c0_i32 : i32
    %1 = arith.extui %0 : i1 to i32
    %c0_i32_0 = arith.constant 0 : i32
    %2 = arith.cmpi ne, %1, %c0_i32_0 : i32
    scf.if %2 {
      %cst_30 = arith.constant 0.000000e+00 : f32
      %53 = vector.broadcast %cst_30 : f32 to vector<1x8x128xf32>
      %c0_31 = arith.constant 0 : index
      %c0_32 = arith.constant 0 : index
      %c0_33 = arith.constant 0 : index
      %54 = vector.load %arg8[%c0_31, %c0_32, %c0_33] : memref<1x8x128xf32, #tpu.memory_space<vmem>>, vector<1x8x128xf32>
      tpu.vector_store %arg8[%c0_31, %c0_32, %c0_33], %53 {strides = array<i32>} : memref<1x8x128xf32, #tpu.memory_space<vmem>>, vector<1x8x128xf32>,
      %cst_34 = arith.constant 0.000000e+00 : f32
      %55 = vector.broadcast %cst_34 : f32 to vector<1x8x128xf32>
      %c0_35 = arith.constant 0 : index
      %c0_36 = arith.constant 0 : index
      %c0_37 = arith.constant 0 : index
      %56 = vector.load %arg9[%c0_35, %c0_36, %c0_37] : memref<1x8x128xf32, #tpu.memory_space<vmem>>, vector<1x8x128xf32>
      tpu.vector_store %arg9[%c0_35, %c0_36, %c0_37], %55 {strides = array<i32>} : memref<1x8x128xf32, #tpu.memory_space<vmem>>, vector<1x8x128xf32>,
    } else {
    }
    %c0 = arith.constant 0 : index
    %c0_1 = arith.constant 0 : index
    %c0_2 = arith.constant 0 : index
    %3 = vector.load %arg3[%c0, %c0_1, %c0_2] : memref<1x128x128xbf16, #tpu.memory_space<vmem>>, vector<1x128x128xbf16>
    %4 = vector.shape_cast %3 : vector<1x128x128xbf16> to vector<128x128xbf16>
    %c0_3 = arith.constant 0 : index
    %c0_4 = arith.constant 0 : index
    %c0_5 = arith.constant 0 : index
    %5 = vector.load %arg4[%c0_3, %c0_4, %c0_5] : memref<1x128x128xbf16, #tpu.memory_space<vmem>>, vector<1x128x128xbf16>
    %6 = vector.shape_cast %5 : vector<1x128x128xbf16> to vector<128x128xbf16>
    %c0_6 = arith.constant 0 : index
    %c0_7 = arith.constant 0 : index
    %7 = vector.load %arg5[%c0_6, %c0_7] : memref<128x128xbf16, #tpu.memory_space<vmem>>, vector<128x128xbf16>
    %c0_8 = arith.constant 0 : index
    %c0_9 = arith.constant 0 : index
    %8 = vector.load %arg6[%c0_8, %c0_9] : memref<1x128xf32, #tpu.memory_space<vmem>>, vector<1x128xf32>
    %cst = arith.constant dense<0.000000e+00> : vector<128x128xf32>
    %9 = tpu.matmul %4, %6, %cst {dimension_numbers = #tpu.dot_dimension_numbers<[1], [0], [0], [1], [0, 0, 1, 1], [], []>} : vector<128x128xbf16>, vector<128x128xbf16>, vector<128x128xf32> -> vector<128x128xf32>
    %10 = arith.truncf %9 : vector<128x128xf32> to vector<128x128xbf16>
    %cst_10 = arith.constant dense<0.000000e+00> : vector<128x128xf32>
    %11 = tpu.matmul %10, %7, %cst_10 {dimension_numbers = #tpu.dot_dimension_numbers<[1], [0], [0], [1], [0, 0, 1, 1], [], []>} : vector<128x128xbf16>, vector<128x128xbf16>, vector<128x128xf32> -> vector<128x128xf32>
    %12 = vector.broadcast %8 : vector<1x128xf32> to vector<128x128xf32>
    %13 = arith.addf %11, %12 : vector<128x128xf32>
    %14 = arith.mulf %13, %13 : vector<128x128xf32>
    %cst_11 = arith.constant dense<0.000000e+00> : vector<128xf32>
    %15 = vector.multi_reduction <add>, %14, %cst_11 [1] : vector<128x128xf32> to vector<128xf32>
    %16 = vector.shape_cast %15 : vector<128xf32> to vector<128x1xf32>
    %cst_12 = arith.constant 1.000000e-24 : f32
    %17 = vector.broadcast %cst_12 : f32 to vector<128x1xf32>
    %18 = arith.maximumf %16, %17 : vector<128x1xf32>
    %19 = math.rsqrt %18 : vector<128x1xf32>
    %20 = vector.broadcast %19 : vector<128x1xf32> to vector<128x128xf32>
    %21 = arith.mulf %13, %20 : vector<128x128xf32>
    %c0_13 = arith.constant 0 : index
    %c0_14 = arith.constant 0 : index
    %c0_15 = arith.constant 0 : index
    %22 = vector.load %arg7[%c0_13, %c0_14, %c0_15] : memref<1x128x128xf32, #tpu.memory_space<vmem>>, vector<1x128x128xf32>
    %23 = vector.shape_cast %22 : vector<1x128x128xf32> to vector<128x128xf32>
    %24 = vector.shape_cast %21 : vector<128x128xf32> to vector<1x128x128xf32>
    tpu.vector_store %arg7[%c0_13, %c0_14, %c0_15], %24 {strides = array<i32>} : memref<1x128x128xf32, #tpu.memory_space<vmem>>, vector<1x128x128xf32>,
    %25 = tpu.iota {dimensions = array<i32: 0>} : vector<128x1xi32>
    %c128_i32 = arith.constant 128 : i32
    %26 = arith.muli %arg1, %c128_i32 : i32
    %27 = vector.broadcast %26 : i32 to vector<128x1xi32>
    %28 = arith.addi %25, %27 : vector<128x1xi32>
    %29 = arith.index_cast %arg0 : i32 to index
    %30 = memref.load %arg2[%29] : memref<2xi32, #tpu.memory_space<smem>>
    %31 = vector.broadcast %30 : i32 to vector<128x1xi32>
    %32 = arith.cmpi slt, %28, %31 : vector<128x1xi32>
    %33 = arith.extui %32 : vector<128x1xi1> to vector<128x1xi32>
    %34 = arith.sitofp %33 : vector<128x1xi32> to vector<128x1xf32>
    %35 = vector.broadcast %34 : vector<128x1xf32> to vector<128x128xf32>
    %36 = arith.mulf %21, %35 : vector<128x128xf32>
    %37 = vector.shape_cast %36 : vector<128x128xf32> to vector<16x8x128xf32>
    %c0_16 = arith.constant 0 : index
    %c0_17 = arith.constant 0 : index
    %c0_18 = arith.constant 0 : index
    %38 = vector.load %arg8[%c0_16, %c0_17, %c0_18] : memref<1x8x128xf32, #tpu.memory_space<vmem>>, vector<1x8x128xf32>
    %39 = vector.shape_cast %38 : vector<1x8x128xf32> to vector<8x128xf32>
    %cst_19 = arith.constant dense<0.000000e+00> : vector<8x128xf32>
    %40 = vector.multi_reduction <add>, %37, %cst_19 [0] : vector<16x8x128xf32> to vector<8x128xf32>
    %41 = arith.addf %39, %40 : vector<8x128xf32>
    %c0_20 = arith.constant 0 : index
    %c0_21 = arith.constant 0 : index
    %c0_22 = arith.constant 0 : index
    %42 = vector.load %arg8[%c0_20, %c0_21, %c0_22] : memref<1x8x128xf32, #tpu.memory_space<vmem>>, vector<1x8x128xf32>
    %43 = vector.shape_cast %42 : vector<1x8x128xf32> to vector<8x128xf32>
    %44 = vector.shape_cast %41 : vector<8x128xf32> to vector<1x8x128xf32>
    tpu.vector_store %arg8[%c0_20, %c0_21, %c0_22], %44 {strides = array<i32>} : memref<1x8x128xf32, #tpu.memory_space<vmem>>, vector<1x8x128xf32>,
    %c0_23 = arith.constant 0 : index
    %c0_24 = arith.constant 0 : index
    %c0_25 = arith.constant 0 : index
    %45 = vector.load %arg9[%c0_23, %c0_24, %c0_25] : memref<1x8x128xf32, #tpu.memory_space<vmem>>, vector<1x8x128xf32>
    %46 = vector.shape_cast %45 : vector<1x8x128xf32> to vector<8x128xf32>
    %47 = arith.mulf %37, %37 : vector<16x8x128xf32>
    %cst_26 = arith.constant dense<0.000000e+00> : vector<8x128xf32>
    %48 = vector.multi_reduction <add>, %47, %cst_26 [0] : vector<16x8x128xf32> to vector<8x128xf32>
    %49 = arith.addf %46, %48 : vector<8x128xf32>
    %c0_27 = arith.constant 0 : index
    %c0_28 = arith.constant 0 : index
    %c0_29 = arith.constant 0 : index
    %50 = vector.load %arg9[%c0_27, %c0_28, %c0_29] : memref<1x8x128xf32, #tpu.memory_space<vmem>>, vector<1x8x128xf32>
    %51 = vector.shape_cast %50 : vector<1x8x128xf32> to vector<8x128xf32>
    %52 = vector.shape_cast %49 : vector<8x128xf32> to vector<1x8x128xf32>
    tpu.vector_store %arg9[%c0_27, %c0_28, %c0_29], %52 {strides = array<i32>} : memref<1x8x128xf32, #tpu.memory_space<vmem>>, vector<1x8x128xf32>,
    return
  }
  func.func @transform_0(%arg0: i32, %arg1: i32, %arg2: memref<2xi32, #tpu.memory_space<smem>>) -> (i32, i32, i32) {
    %c0_i32 = arith.constant 0 : i32
    %c0_i32_0 = arith.constant 0 : i32
    return %arg0, %arg1, %c0_i32 : i32, i32, i32
  }
  func.func @transform_1(%arg0: i32, %arg1: i32, %arg2: memref<2xi32, #tpu.memory_space<smem>>) -> (i32, i32, i32) {
    %c0_i32 = arith.constant 0 : i32
    %c0_i32_0 = arith.constant 0 : i32
    %c0_i32_1 = arith.constant 0 : i32
    return %arg0, %c0_i32, %c0_i32_0 : i32, i32, i32
  }
  func.func @transform_2(%arg0: i32, %arg1: i32, %arg2: memref<2xi32, #tpu.memory_space<smem>>) -> (i32, i32) {
    %c0_i32 = arith.constant 0 : i32
    %c0_i32_0 = arith.constant 0 : i32
    %c0_i32_1 = arith.constant 0 : i32
    return %c0_i32, %c0_i32_0 : i32, i32
  }
  func.func @transform_3(%arg0: i32, %arg1: i32, %arg2: memref<2xi32, #tpu.memory_space<smem>>) -> (i32, i32) {
    %c0_i32 = arith.constant 0 : i32
    %c0_i32_0 = arith.constant 0 : i32
    %c0_i32_1 = arith.constant 0 : i32
    return %c0_i32, %c0_i32_0 : i32, i32
  }
  func.func @transform_4(%arg0: i32, %arg1: i32, %arg2: memref<2xi32, #tpu.memory_space<smem>>) -> (i32, i32, i32) {
    %c0_i32 = arith.constant 0 : i32
    %c0_i32_0 = arith.constant 0 : i32
    return %arg0, %arg1, %c0_i32 : i32, i32, i32
  }
  func.func @transform_5(%arg0: i32, %arg1: i32, %arg2: memref<2xi32, #tpu.memory_space<smem>>) -> (i32, i32, i32) {
    %c0_i32 = arith.constant 0 : i32
    %c0_i32_0 = arith.constant 0 : i32
    %c0_i32_1 = arith.constant 0 : i32
    return %arg0, %c0_i32, %c0_i32_0 : i32, i32, i32
  }
  func.func @transform_6(%arg0: i32, %arg1: i32, %arg2: memref<2xi32, #tpu.memory_space<smem>>) -> (i32, i32, i32) {
    %c0_i32 = arith.constant 0 : i32
    %c0_i32_0 = arith.constant 0 : i32
    %c0_i32_1 = arith.constant 0 : i32
    return %arg0, %c0_i32, %c0_i32_0 : i32, i32, i32
  }
}

module attributes {stable_mosaic.version = 11 : i64} {
  func.func @gcn_phase2_kernel(%arg0: i32, %arg1: i32, %arg2: memref<2xi32, #tpu.memory_space<smem>>, %arg3: memref<1x128x128xf32, #tpu.memory_space<vmem>>, %arg4: memref<1x128xf32, #tpu.memory_space<vmem>>, %arg5: memref<1x128xf32, #tpu.memory_space<vmem>>, %arg6: memref<1x128x128xf32, #tpu.memory_space<vmem>>) attributes {dimension_semantics = [#tpu.dimension_semantics<parallel>, #tpu.dimension_semantics<parallel>], iteration_bounds = array<i64: 2, 1>, scalar_prefetch = 1 : i64, scratch_operands = 0 : i64, tpu.core_type = #tpu.core_type<tc>, window_params = [{transform_indices = @transform_0, window_bounds = array<i64: 1, 128, 128>}, {pipeline_mode = #tpu.pipeline_mode<synchronous>, transform_indices = @transform_1, window_bounds = array<i64: 1, 128>}, {pipeline_mode = #tpu.pipeline_mode<synchronous>, transform_indices = @transform_2, window_bounds = array<i64: 1, 128>}, {transform_indices = @transform_3, window_bounds = array<i64: 1, 128, 128>}]} {
    %c0 = arith.constant 0 : index
    %c0_0 = arith.constant 0 : index
    %c0_1 = arith.constant 0 : index
    %0 = vector.load %arg3[%c0, %c0_0, %c0_1] : memref<1x128x128xf32, #tpu.memory_space<vmem>>, vector<1x128x128xf32>
    %1 = vector.shape_cast %0 : vector<1x128x128xf32> to vector<128x128xf32>
    %2 = tpu.iota {dimensions = array<i32: 0>} : vector<128x1xi32>
    %c128_i32 = arith.constant 128 : i32
    %3 = arith.muli %arg1, %c128_i32 : i32
    %4 = vector.broadcast %3 : i32 to vector<128x1xi32>
    %5 = arith.addi %2, %4 : vector<128x1xi32>
    %6 = arith.index_cast %arg0 : i32 to index
    %7 = memref.load %arg2[%6] : memref<2xi32, #tpu.memory_space<smem>>
    %8 = vector.broadcast %7 : i32 to vector<128x1xi32>
    %9 = arith.cmpi slt, %5, %8 : vector<128x1xi32>
    %10 = arith.extui %9 : vector<128x1xi1> to vector<128x1xi32>
    %11 = arith.sitofp %10 : vector<128x1xi32> to vector<128x1xf32>
    %c0_2 = arith.constant 0 : index
    %c0_3 = arith.constant 0 : index
    %12 = vector.load %arg4[%c0_2, %c0_3] : memref<1x128xf32, #tpu.memory_space<vmem>>, vector<1x128xf32>
    %13 = vector.broadcast %12 : vector<1x128xf32> to vector<128x128xf32>
    %14 = arith.mulf %1, %13 : vector<128x128xf32>
    %c0_4 = arith.constant 0 : index
    %c0_5 = arith.constant 0 : index
    %15 = vector.load %arg5[%c0_4, %c0_5] : memref<1x128xf32, #tpu.memory_space<vmem>>, vector<1x128xf32>
    %16 = vector.broadcast %15 : vector<1x128xf32> to vector<128x128xf32>
    %17 = arith.addf %14, %16 : vector<128x128xf32>
    %18 = vector.broadcast %11 : vector<128x1xf32> to vector<128x128xf32>
    %19 = arith.mulf %17, %18 : vector<128x128xf32>
    %cst = arith.constant 0.000000e+00 : f32
    %20 = vector.broadcast %cst : f32 to vector<128x128xf32>
    %21 = arith.maximumf %19, %20 : vector<128x128xf32>
    %c0_6 = arith.constant 0 : index
    %c0_7 = arith.constant 0 : index
    %c0_8 = arith.constant 0 : index
    %22 = vector.load %arg6[%c0_6, %c0_7, %c0_8] : memref<1x128x128xf32, #tpu.memory_space<vmem>>, vector<1x128x128xf32>
    %23 = vector.shape_cast %22 : vector<1x128x128xf32> to vector<128x128xf32>
    %24 = vector.shape_cast %21 : vector<128x128xf32> to vector<1x128x128xf32>
    tpu.vector_store %arg6[%c0_6, %c0_7, %c0_8], %24 {strides = array<i32>} : memref<1x128x128xf32, #tpu.memory_space<vmem>>, vector<1x128x128xf32>,
    return
  }
  func.func @transform_0(%arg0: i32, %arg1: i32, %arg2: memref<2xi32, #tpu.memory_space<smem>>) -> (i32, i32, i32) {
    %c0_i32 = arith.constant 0 : i32
    %c0_i32_0 = arith.constant 0 : i32
    return %arg0, %arg1, %c0_i32 : i32, i32, i32
  }
  func.func @transform_1(%arg0: i32, %arg1: i32, %arg2: memref<2xi32, #tpu.memory_space<smem>>) -> (i32, i32) {
    %c0_i32 = arith.constant 0 : i32
    %c0_i32_0 = arith.constant 0 : i32
    %c0_i32_1 = arith.constant 0 : i32
    return %c0_i32, %c0_i32_0 : i32, i32
  }
  func.func @transform_2(%arg0: i32, %arg1: i32, %arg2: memref<2xi32, #tpu.memory_space<smem>>) -> (i32, i32) {
    %c0_i32 = arith.constant 0 : i32
    %c0_i32_0 = arith.constant 0 : i32
    %c0_i32_1 = arith.constant 0 : i32
    return %c0_i32, %c0_i32_0 : i32, i32
  }
  func.func @transform_3(%arg0: i32, %arg1: i32, %arg2: memref<2xi32, #tpu.memory_space<smem>>) -> (i32, i32, i32) {
    %c0_i32 = arith.constant 0 : i32
    %c0_i32_0 = arith.constant 0 : i32
    return %arg0, %arg1, %c0_i32 : i32, i32, i32
  }
}

</mosaic_0001>

<bundles_post_ra>
// kernel: gcn_forward.3
= control target key start
LH: loop header
LB: loop body
LE: loop exit
PB: predicated region body
PF: predicated region fallthrough
CT: control target
= control target key end

     0   :  { %s806_s0 = inlined_call_operand.vmem [shape: s32[2], index: 0, kind: input, shape index: {}]   ;;  %s807_s1 = inlined_call_operand.vmem [shape: f32[2,128,128], index: 1, kind: input, shape index: {}]   ;;  %s808_s2 = inlined_call_operand.vmem [shape: f32[1,128], index: 2, kind: input, shape index: {}]   ;;  %s809_s3 = inlined_call_operand.vmem [shape: f32[1,128], index: 3, kind: input, shape index: {}]   ;;  %s810_s4 = inlined_call_operand.vmem [shape: f32[2,128,128], index: 4, kind: output, shape index: {}]  }
   0x1   :  { %s9_s17 = sshll.u32 %s806_s0, 4  ;;  %s10_s17 = int_to_ptr.vmem [resolvable:$true] %s9_s17 }
   0x2   :  { %s556_s18 = scalar_lea.vmem %s10_s17, 16  ;;  %p561_p1 = scmp.lt.s32.totalorder %s10_s17, %s10_s17 }
   0x3   :  { %p557_p0 = scmp.ne.s32.totalorder %s10_s17, %s556_s18  ;;  %p562_p2 = scmp.lt.s32.totalorder %s556_s18, %s556_s18 }
   0x5   :  { %p563_p3 = por %p562_p2, %p561_p1 }
   0x7   :  { %p564_p4 = pnand %p563_p3, %p557_p0 }
   0x9   :  { %567 = shalt.err (!%p564_p4)  }
   0xa   :  { %s594_s19 = smov [#allocation3]  }
   0xb   :  { %12 = dma.vmem_to_smem %s10_s17, 16, %s594_s19, [#allocation2] }
   0xc   :  { %580 = dma.done.wait [#allocation2], 16 }
   0xd   :  { %581 = vsyncadd [#allocation2], 4294967280 }
   0xe   :  { %14 = sfence }
   0xf   :  { %s624_s20 = smov 0   ;;  %s626_s21 = smov 0  }
  0x10   :  { %s628_s22 = smov 0  }
  0x11 LB: > { %s32_s0 = sadd.s32 1, %s588_s21  ;;  %p503_p5 = scmp.ge.s32.totalorder %s592_s22, 1  ;;  %s592_s22 = sphi %s628_s22, %s20_s22   ;;  %s588_s21 = sphi %s626_s21, %s812_s21   ;;  %s584_s20 = sphi %s624_s20, %s811_s20  }
  0x12   : > { %p34_p6 = scmp.ge.s32.totalorder %s32_s0, 2  ;;  %p165_p7 = scmp.lt.s32.totalorder %s592_s22, 3 }
  0x14   : > { %s814_s0 = smov (%p34_p6, %s32_s0), 0  ;;  %p166_p8 = pnand %p503_p5, %p165_p7 }
  0x15   : > { %p198_p9 = scmp.lt.s32.totalorder (!%p166_p8), %s584_s20, 1  ;;  %v233_v0 = vlaneseq (!%p166_p8)  ;;  %s268_s23 = sld [smem:[#allocation3 + %s584_s20]] (!%p166_p8)  ;;  %v649_v2 = vld [vmem:[%s808_s2] ss:$0 sm:$0xff] (!%p166_p8)  ;;  %v595_v22 = vmov (!%p166_p8), 0.0  }
  0x16   : > { %169 = sbr.rel (%p166_p8) target bundleno = 59 (0x3b), region = 32  ;;  %v666_v7 = vld [vmem:[%s809_s3] ss:$0 sm:$0xff] (!%p166_p8) }
  0x17   : > { %v644_v1 = vshrl.u32 (!%p166_p8), %v233_v0, 7 }
  0x19   : > { %v235_v3 = vadd.s32 (!%p166_p8), 8, %v644_v1  ;;  %v236_v4 = vadd.s32 (!%p166_p8), 16, %v644_v1  ;;  %v237_v5 = vadd.s32 (!%p166_p8), 24, %v644_v1  ;;  %v238_v6 = vadd.s32 (!%p166_p8), 32, %v644_v1 }
  0x1a   : > { %v239_v8 = vadd.s32 (!%p166_p8), 40, %v644_v1  ;;  %v240_v9 = vadd.s32 (!%p166_p8), 48, %v644_v1  ;;  %v241_v10 = vadd.s32 (!%p166_p8), 56, %v644_v1  ;;  %v672_v11 = vadd.s32 (!%p166_p8), 64, %v644_v1 }
  0x1b   : > { %v675_v13 = vstv (!%p166_p8), %s268_s23  ;;  %v680_v16 = vadd.s32 (!%p166_p8), 72, %v644_v1  ;;  %v683_v17 = vadd.s32 (!%p166_p8), 80, %v644_v1  ;;  %v686_v18 = vadd.s32 (!%p166_p8), 88, %v644_v1 }
  0x1c   : > { %vm270_vm0 = vcmp.lt.s32.totalorder (!%p166_p8), %v644_v1, %v675_v13  ;;  %vm271_vm1 = vcmp.lt.s32.totalorder (!%p166_p8), %v235_v3, %v675_v13  ;;  %vm272_vm2 = vcmp.lt.s32.totalorder (!%p166_p8), %v236_v4, %v675_v13  ;;  %vm273_vm3 = vcmp.lt.s32.totalorder (!%p166_p8), %v237_v5, %v675_v13 }
  0x1d   : > { %s816_s20 = smov (!%p198_p9, %s584_s20), 1  ;;  %v508_v23 = vsel %vm270_vm0, 1.0, %v595_v22  ;;  %v509_v24 = vsel %vm271_vm1, 1.0, %v595_v22  ;;  %v510_v29 = vsel %vm272_vm2, 1.0, %v595_v22  ;;  %v511_v32 = vsel %vm273_vm3, 1.0, %v595_v22 }
  0x1e   : > { %s528_s26 = sshll.u32 %s816_s20, 7  ;;  %vm274_vm4 = vcmp.lt.s32.totalorder %v238_v6, %v675_v13  ;;  %vm275_vm5 = vcmp.lt.s32.totalorder %v239_v8, %v675_v13  ;;  %vm276_vm6 = vcmp.lt.s32.totalorder %v240_v9, %v675_v13  ;;  %vm277_vm7 = vcmp.lt.s32.totalorder %v241_v10, %v675_v13 }
  0x1f   : > { %s661_s29 = scalar_lea.vmem %s807_s1, %s528_s26  ;;  %v512_v36 = vsel %vm274_vm4, 1.0, %v595_v22  ;;  %s715_s8 = scalar_lea.vmem %s810_s4, %s528_s26  ;;  %v513_v45 = vsel %vm275_vm5, 1.0, %v595_v22  ;;  %v514_v52 = vsel %vm276_vm6, 1.0, %v595_v22  ;;  %v515_v56 = vsel %vm277_vm7, 1.0, %v595_v22 }
  0x20   : > { %v217_v12 = vld [vmem:[%s661_s29] sm:$0xff]  ;;  %v218_v14 = vld [vmem:[%s661_s29 + $0x8] sm:$0xff]  ;;  %v219_v15 = vld [vmem:[%s661_s29 + $0x10] sm:$0xff]  ;;  %vm278_vm8 = vcmp.lt.s32.totalorder %v672_v11, %v675_v13  ;;  %vm279_vm9 = vcmp.lt.s32.totalorder %v680_v16, %v675_v13  ;;  %vm280_vm10 = vcmp.lt.s32.totalorder %v683_v17, %v675_v13  ;;  %vm281_vm11 = vcmp.lt.s32.totalorder %v686_v18, %v675_v13 }
  0x21   : > { %v325_v19 = vmul.f32 %v649_v2, %v217_v12  ;;  %v326_v20 = vmul.f32 %v649_v2, %v218_v14  ;;  %v220_v21 = vld [vmem:[%s661_s29 + $0x18] sm:$0xff]  ;;  %v327_v25 = vmul.f32 %v649_v2, %v219_v15  ;;  %v221_v26 = vld [vmem:[%s661_s29 + $0x20] sm:$0xff]  ;;  %v222_v30 = vld [vmem:[%s661_s29 + $0x28] sm:$0xff]  ;;  %v516_v3 = vsel %vm278_vm8, 1.0, %v595_v22 }
  0x22   : > { %v328_v33 = vmul.f32 %v649_v2, %v220_v21  ;;  %v329_v37 = vmul.f32 %v649_v2, %v221_v26  ;;  %v330_v40 = vmul.f32 %v649_v2, %v222_v30  ;;  %v223_v41 = vld [vmem:[%s661_s29 + $0x30] sm:$0xff]  ;;  %v224_v46 = vld [vmem:[%s661_s29 + $0x38] sm:$0xff]  ;;  %v225_v50 = vld [vmem:[%s661_s29 + $0x40] sm:$0xff]  ;;  %v517_v6 = vsel %vm279_vm9, 1.0, %v595_v22 }
  0x23   : > { %v348_v27 = vadd.f32 %v666_v7, %v325_v19  ;;  %v349_v28 = vadd.f32 %v666_v7, %v326_v20  ;;  %v350_v31 = vadd.f32 %v666_v7, %v327_v25  ;;  %v331_v53 = vmul.f32 %v649_v2, %v223_v41  ;;  %v226_v58 = vld [vmem:[%s661_s29 + $0x48] sm:$0xff]  ;;  %v227_v62 = vld [vmem:[%s661_s29 + $0x50] sm:$0xff]  ;;  %v228_v9 = vld [vmem:[%s661_s29 + $0x58] sm:$0xff] }
  0x24   : > { %v351_v39 = vadd.f32 %v666_v7, %v328_v33  ;;  %v352_v44 = vadd.f32 %v666_v7, %v329_v37  ;;  %v353_v49 = vadd.f32 %v666_v7, %v330_v40  ;;  %v332_v57 = vmul.f32 %v649_v2, %v224_v46  ;;  %v229_v12 = vld [vmem:[%s661_s29 + $0x60] sm:$0xff]  ;;  %v230_v20 = vld [vmem:[%s661_s29 + $0x68] sm:$0xff] }
  0x25   : > { %v364_v34 = vmul.f32 %v508_v23, %v348_v27  ;;  %v365_v35 = vmul.f32 %v509_v24, %v349_v28  ;;  %v366_v38 = vmul.f32 %v510_v29, %v350_v31  ;;  %v354_v60 = vadd.f32 %v666_v7, %v331_v53 }
  0x26   : > { %v367_v48 = vmul.f32 %v511_v32, %v351_v39  ;;  %v368_v51 = vmul.f32 %v512_v36, %v352_v44  ;;  %v369_v55 = vmul.f32 %v513_v45, %v353_v49  ;;  %v333_v61 = vmul.f32 %v649_v2, %v225_v50  ;;  %v232_v39 = vld [vmem:[%s661_s29 + $0x78] sm:$0xff] }
  0x27   : > { %v380_v42 = vmax.f32 %v364_v34, 0.0  ;;  %v381_v43 = vmax.f32 %v365_v35, 0.0  ;;  %v382_v47 = vmax.f32 %v366_v38, 0.0  ;;  %v355_v0 = vadd.f32 %v666_v7, %v332_v57  ;;  %v231_v34 = vld [vmem:[%s661_s29 + $0x70] sm:$0xff] }
  0x28   : > { %v383_v54 = vmax.f32 %v367_v48, 0.0  ;;  %v384_v59 = vmax.f32 %v368_v51, 0.0  ;;  %v385_v63 = vmax.f32 %v369_v55, 0.0  ;;  %v370_v4 = vmul.f32 %v514_v52, %v354_v60 }
  0x29   : > { %396 = vst [vmem:[%s715_s8] sm:$0xff] %v380_v42  ;;  %397 = vst [vmem:[%s715_s8 + $0x8] sm:$0xff] %v381_v43  ;;  %v356_v5 = vadd.f32 %v666_v7, %v333_v61  ;;  %v334_v8 = vmul.f32 %v649_v2, %v226_v58  ;;  %v371_v10 = vmul.f32 %v515_v56, %v355_v0  ;;  %v518_v19 = vsel %vm280_vm10, 1.0, %v595_v22 }
  0x2a   : > { %398 = vst [vmem:[%s715_s8 + $0x10] sm:$0xff] %v382_v47  ;;  %399 = vst [vmem:[%s715_s8 + $0x18] sm:$0xff] %v383_v54  ;;  %v335_v11 = vmul.f32 %v649_v2, %v227_v62  ;;  %v386_v14 = vmax.f32 %v370_v4, 0.0  ;;  %v519_v17 = vsel %vm281_vm11, 1.0, %v595_v22  ;;  %v336_v24 = vmul.f32 %v649_v2, %v228_v9 }
  0x2b   : > { %400 = vst [vmem:[%s715_s8 + $0x20] sm:$0xff] %v384_v59  ;;  %401 = vst [vmem:[%s715_s8 + $0x28] sm:$0xff] %v385_v63  ;;  %v372_v15 = vmul.f32 %v516_v3, %v356_v5  ;;  %v357_v16 = vadd.f32 %v666_v7, %v334_v8  ;;  %v387_v21 = vmax.f32 %v371_v10, 0.0  ;;  %v246_v26 = vadd.s32 96, %v644_v1 }
  0x2c   : > { %v358_v23 = vadd.f32 %v666_v7, %v335_v11  ;;  %402 = vst [vmem:[%s715_s8 + $0x30] sm:$0xff] %v386_v14  ;;  %v337_v27 = vmul.f32 %v649_v2, %v229_v12  ;;  %v359_v29 = vadd.f32 %v666_v7, %v336_v24  ;;  %v247_v30 = vadd.s32 104, %v644_v1 }
  0x2d   : > { %v388_v18 = vmax.f32 %v372_v15, 0.0  ;;  %v373_v25 = vmul.f32 %v517_v6, %v357_v16  ;;  %403 = vst [vmem:[%s715_s8 + $0x38] sm:$0xff] %v387_v21  ;;  %v338_v31 = vmul.f32 %v649_v2, %v230_v20  ;;  %vm282_vm12 = vcmp.lt.s32.totalorder %v246_v26, %v675_v13 }
  0x2e   : > { %v374_v28 = vmul.f32 %v518_v19, %v358_v23  ;;  %v360_v33 = vadd.f32 %v666_v7, %v337_v27  ;;  %v248_v35 = vadd.s32 112, %v644_v1  ;;  %v375_v37 = vmul.f32 %v519_v17, %v359_v29 }
  0x2f   : > { %404 = vst [vmem:[%s715_s8 + $0x40] sm:$0xff] %v388_v18  ;;  %v389_v32 = vmax.f32 %v373_v25, 0.0  ;;  %v520_v38 = vsel %vm282_vm12, 1.0, %v595_v22  ;;  %vm283_vm13 = vcmp.lt.s32.totalorder %v247_v30, %v675_v13  ;;  %v361_v42 = vadd.f32 %v666_v7, %v338_v31 }
  0x30   : > { %v390_v36 = vmax.f32 %v374_v28, 0.0  ;;  %v376_v40 = vmul.f32 %v520_v38, %v360_v33  ;;  %v521_v41 = vsel %vm283_vm13, 1.0, %v595_v22  ;;  %vm284_vm14 = vcmp.lt.s32.totalorder %v248_v35, %v675_v13 }
  0x31   : > { %405 = vst [vmem:[%s715_s8 + $0x48] sm:$0xff] %v389_v32  ;;  %v391_v43 = vmax.f32 %v375_v37, 0.0  ;;  %v339_v44 = vmul.f32 %v649_v2, %v231_v34  ;;  %v249_v45 = vadd.s32 120, %v644_v1  ;;  %v377_v47 = vmul.f32 %v521_v41, %v361_v42 }
  0x32   : > { %406 = vst [vmem:[%s715_s8 + $0x50] sm:$0xff] %v390_v36  ;;  %v392_v46 = vmax.f32 %v376_v40, 0.0  ;;  %v522_v48 = vsel %vm284_vm14, 1.0, %v595_v22  ;;  %v340_v49 = vmul.f32 %v649_v2, %v232_v39 }
  0x33   : > { %407 = vst [vmem:[%s715_s8 + $0x58] sm:$0xff] %v391_v43  ;;  %v362_v50 = vadd.f32 %v666_v7, %v339_v44  ;;  %vm285_vm15 = vcmp.lt.s32.totalorder %v249_v45, %v675_v13  ;;  %v393_v51 = vmax.f32 %v377_v47, 0.0 }
  0x34   : > { %408 = vst [vmem:[%s715_s8 + $0x60] sm:$0xff] %v392_v46  ;;  %v523_v52 = vsel %vm285_vm15, 1.0, %v595_v22  ;;  %v363_v53 = vadd.f32 %v666_v7, %v340_v49 }
  0x35   : > { %v378_v1 = vmul.f32 %v522_v48, %v362_v50  ;;  %409 = vst [vmem:[%s715_s8 + $0x68] sm:$0xff] %v393_v51 }
  0x36   : > { %v379_v54 = vmul.f32 %v523_v52, %v363_v53 }
  0x37   : > { %v394_v55 = vmax.f32 %v378_v1, 0.0 }
  0x38   : > { %v395_v56 = vmax.f32 %v379_v54, 0.0 }
  0x39   : > { %410 = vst [vmem:[%s715_s8 + $0x70] sm:$0xff] %v394_v55 }
  0x3a   : > { %411 = vst [vmem:[%s715_s8 + $0x78] sm:$0xff] %v395_v56 }
  0x3b PF: > { %s20_s22 = sadd.s32 1, %s592_s22   ;;  %s811_s20 = smov %s588_s21 }
  0x3c   : > { %p17_p10 = scmp.ge.s32.totalorder %s20_s22, 4   ;;  %s812_s21 = smov %s814_s0 }
  0x3e   :  { %19 = sbr.rel (!%p17_p10) target bundleno = 17 (0x11), region = 62 }

// kernel: gcn_forward.2
= control target key start
LH: loop header
LB: loop body
LE: loop exit
PB: predicated region body
PF: predicated region fallthrough
CT: control target
= control target key end

     0   :  { %s1777_s0 = inlined_call_operand.vmem [shape: s32[2], index: 0, kind: input, shape index: {}]   ;;  %s1778_s1 = inlined_call_operand.vmem [shape: bf16[2,128,128], index: 1, kind: input, shape index: {}]   ;;  %s1779_s2 = inlined_call_operand.vmem [shape: bf16[2,128,128], index: 2, kind: input, shape index: {}]   ;;  %s1780_s3 = inlined_call_operand.vmem [shape: bf16[128,128], index: 3, kind: input, shape index: {}]   ;;  %s1781_s4 = inlined_call_operand.vmem [shape: f32[1,128], index: 4, kind: input, shape index: {}]   ;;  %s1782_s5 = inlined_call_operand.vmem [shape: f32[2,128,128], index: 5, kind: output, shape index: {0}]   ;;  %s1783_s6 = inlined_call_operand.vmem [shape: f32[2,8,128], index: 6, kind: output, shape index: {1}]   ;;  %s1784_s7 = inlined_call_operand.vmem [shape: f32[2,8,128], index: 7, kind: output, shape index: {2}]  }
   0x1   :  { %s13_s26 = sshll.u32 %s1777_s0, 4  ;;  %s14_s26 = int_to_ptr.vmem [resolvable:$true] %s13_s26 }
   0x2   :  { %s1410_s27 = scalar_lea.vmem %s14_s26, 16  ;;  %p1415_p1 = scmp.lt.s32.totalorder %s14_s26, %s14_s26 }
   0x3   :  { %p1411_p0 = scmp.ne.s32.totalorder %s14_s26, %s1410_s27  ;;  %p1416_p2 = scmp.lt.s32.totalorder %s1410_s27, %s1410_s27 }
   0x5   :  { %p1417_p3 = por %p1416_p2, %p1415_p1 }
   0x7   :  { %p1418_p4 = pnand %p1417_p3, %p1411_p0 }
   0x9   :  { %1421 = shalt.err (!%p1418_p4)  }
   0xa   :  { %s1448_s28 = smov [#allocation3]  }
   0xb   :  { %16 = dma.vmem_to_smem %s14_s26, 16, %s1448_s28, [#allocation2] }
   0xc   :  { %1434 = dma.done.wait [#allocation2], 16 }
   0xd   :  { %1435 = vsyncadd [#allocation2], 4294967280 }
   0xe   :  { %18 = sfence }
   0xf   :  { %s1493_s29 = smov 0   ;;  %s1495_s30 = smov 0  }
  0x10   :  { %s1497_s8 = smov 0  }
  0x11 LB: > { %s36_s0 = sadd.s32 1, %s1442_s30  ;;  %p1177_p5 = scmp.ge.s32.totalorder %s1446_s8, 1  ;;  %s1446_s8 = sphi %s1497_s8, %s24_s8   ;;  %s1442_s30 = sphi %s1495_s30, %s1786_s30   ;;  %s1438_s29 = sphi %s1493_s29, %s1785_s29  }
  0x12   : > { %p38_p6 = scmp.ge.s32.totalorder %s36_s0, 2  ;;  %p255_p7 = scmp.lt.s32.totalorder %s1446_s8, 3 }
  0x14   : > { %s1788_s0 = smov (%p38_p6, %s36_s0), 0  ;;  %p256_p8 = pnand %p1177_p5, %p255_p7 }
  0x15   : > { %p307_p9 = scmp.lt.s32.totalorder (!%p256_p8), %s1438_s29, 1  ;;  %v1370_v0 = vld [vmem:[%s1780_s3] sm:$0xff] (!%p256_p8)   ;;  %v1371_v1 = vld [vmem:[%s1780_s3 + $0x8] sm:$0xff] (!%p256_p8)   ;;  %v1372_v2 = vld [vmem:[%s1780_s3 + $0x10] sm:$0xff] (!%p256_p8)   ;;  %s894_s16 = sld [smem:[#allocation3 + %s1438_s29]] (!%p256_p8) }
  0x16   : > { %259 = sbr.rel (%p256_p8) target bundleno = 697 (0x2b9), region = 36  ;;  %1296 = vmatprep.subr.bf16.mxu1 (!%p256_p8), %v1370_v0  ;;  %v1373_v5 = vld [vmem:[%s1780_s3 + $0x18] sm:$0xff] (!%p256_p8)   ;;  %v1374_v7 = vld [vmem:[%s1780_s3 + $0x20] sm:$0xff] (!%p256_p8)   ;;  %v1375_v12 = vld [vmem:[%s1780_s3 + $0x28] sm:$0xff] (!%p256_p8)  }
  0x17   : > { %1297 = vmatpush3.bf16.msra.mxu1 (!%p256_p8), %v1370_v0  ;;  %v1376_v13 = vld [vmem:[%s1780_s3 + $0x30] sm:$0xff] (!%p256_p8)   ;;  %v1377_v23 = vld [vmem:[%s1780_s3 + $0x38] sm:$0xff] (!%p256_p8)   ;;  %v1202_v48 = vld [vmem:[%s1781_s4] ss:$0 sm:$0xff] (!%p256_p8) }
  0x18   : > { %1298 = vmatprep.subr.bf16.mxu1 (!%p256_p8), %v1371_v1 }
  0x1b   : > { %1299 = vmatpush3.bf16.msra.mxu1 (!%p256_p8), %v1371_v1 }
  0x1c   : > { %1300 = vmatprep.subr.bf16.mxu1 (!%p256_p8), %v1372_v2 }
  0x1d   : > { %s1521_s13 = scalar_select %p307_p9, %s1438_s29, 1 }
  0x1f   : > { %s1229_s14 = sshll.u32 %s1521_s13, 6  ;;  %1301 = vmatpush3.bf16.msra.mxu1 %v1372_v2  ;;  %s1231_s29 = sshll.u32 %s1521_s13, 7 }
  0x20   : > { %s1530_s19 = scalar_lea.vmem %s1779_s2, %s1229_s14  ;;  %s1541_s24 = scalar_lea.vmem %s1778_s1, %s1229_s14  ;;  %1302 = vmatprep.subr.bf16.mxu1 %v1373_v5 }
  0x21   : > { %v1354_v3 = vld [vmem:[%s1530_s19] sm:$0xff]   ;;  %v1355_v4 = vld [vmem:[%s1530_s19 + $0x8] sm:$0xff]   ;;  %v1356_v6 = vld [vmem:[%s1530_s19 + $0x10] sm:$0xff]   ;;  %s1184_s20 = sshll.u32 %s1521_s13, 3 }
  0x22   : > { %1264 = vmatprep.subr.bf16.mxu0 %v1354_v3  ;;  %v1357_v8 = vld [vmem:[%s1530_s19 + $0x18] sm:$0xff]   ;;  %v1362_v9 = vld [vmem:[%s1541_s24] sm:$0xff]   ;;  %v1359_v11 = vld [vmem:[%s1530_s19 + $0x28] sm:$0xff]   ;;  %s334_s23 = scalar_lea.vmem %s1783_s6, %s1184_s20  ;;  %s338_s26 = scalar_lea.vmem %s1784_s7, %s1184_s20 }
  0x23   : > { %1265 = vmatpush3.bf16.msra.mxu0 %v1354_v3  ;;  %1303 = vmatpush3.bf16.msra.mxu1 %v1373_v5  ;;  %v1358_v10 = vld [vmem:[%s1530_s19 + $0x20] sm:$0xff]   ;;  %v1360_v14 = vld [vmem:[%s1530_s19 + $0x30] sm:$0xff]   ;;  %v1361_v15 = vld [vmem:[%s1530_s19 + $0x38] sm:$0xff]   ;;  %s1655_s19 = scalar_lea.vmem %s1782_s5, %s1231_s29 }
  0x24   : > { %1266 = vmatprep.subr.bf16.mxu0 %v1355_v4  ;;  %1280 = vmatprep.mubr.bf16.mxu0 %v1362_v9  ;;  %v1363_v16 = vld [vmem:[%s1541_s24 + $0x8] sm:$0xff]   ;;  %v1364_v17 = vld [vmem:[%s1541_s24 + $0x10] sm:$0xff]   ;;  %v1365_v18 = vld [vmem:[%s1541_s24 + $0x18] sm:$0xff]  }
  0x25   : > { %1304 = vmatprep.subr.bf16.mxu1 %v1374_v7  ;;  %v1366_v19 = vld [vmem:[%s1541_s24 + $0x20] sm:$0xff]   ;;  %v1367_v20 = vld [vmem:[%s1541_s24 + $0x28] sm:$0xff]   ;;  %v1368_v21 = vld [vmem:[%s1541_s24 + $0x30] sm:$0xff]  }
  0x26   : > { %v1369_v22 = vld [vmem:[%s1541_s24 + $0x38] sm:$0xff]  }
  0x27   : > { %1267 = vmatpush3.bf16.msra.mxu0 %v1355_v4  ;;  %1305 = vmatpush3.bf16.msra.mxu1 %v1374_v7 }
  0x28   : > { %1268 = vmatprep.subr.bf16.mxu0 %v1356_v6  ;;  %1306 = vmatprep.subr.bf16.mxu1 %v1375_v12 }
  0x2b   : > { %1269 = vmatpush3.bf16.msra.mxu0 %v1356_v6  ;;  %1307 = vmatpush3.bf16.msra.mxu1 %v1375_v12 }
  0x2c   : > { %1270 = vmatprep.subr.bf16.mxu0 %v1357_v8  ;;  %1308 = vmatprep.subr.bf16.mxu1 %v1376_v13 }
  0x2f   : > { %1271 = vmatpush3.bf16.msra.mxu0 %v1357_v8  ;;  %1309 = vmatpush3.bf16.msra.mxu1 %v1376_v13 }
  0x30   : > { %1272 = vmatprep.subr.bf16.mxu0 %v1358_v10  ;;  %1310 = vmatprep.subr.bf16.mxu1 %v1377_v23 }
  0x33   : > { %1273 = vmatpush3.bf16.msra.mxu0 %v1358_v10  ;;  %1311 = vmatpush3.bf16.msra.mxu1 %v1377_v23 }
  0x34   : > { %1274 = vmatprep.subr.bf16.mxu0 %v1359_v11 }
  0x37   : > { %1275 = vmatpush3.bf16.msra.mxu0 %v1359_v11 }
  0x38   : > { %1276 = vmatprep.subr.bf16.mxu0 %v1360_v14 }
  0x3b   : > { %1277 = vmatpush3.bf16.msra.mxu0 %v1360_v14 }
  0x3c   : > { %1278 = vmatprep.subr.bf16.mxu0 %v1361_v15 }
  0x3f   : > { %1279 = vmatpush3.bf16.msra.mxu0 %v1361_v15 }
  0x42   : > { %1281 = vmatmul.mubr.bf16.vlgmr.msra.gmra.mrb[0].mxu0 %v1363_v16 }
  0x43   : > { %1284 = vmatprep.mubr.bf16.mxu0 %v1364_v17 }
  0x4a   : > { %1285 = vmatmul.mubr.bf16.gmra.mrb[4].mxu0 %v1365_v18 }
  0x4b   : > { %1288 = vmatprep.mubr.bf16.mxu0 %v1366_v19 }
  0x52   : > { %1289 = vmatmul.mubr.bf16.gmra.mrb[8].mxu0 %v1367_v20 }
  0x53   : > { %1292 = vmatprep.mubr.bf16.mxu0 %v1368_v21 }
  0x5a   : > { %1293 = vmatmul.mubr.bf16.gmra.mrb[12].mxu0 %v1369_v22 }
 0x115   : > { %v1282_v24 = vpop.f32.mrb[0].mxu0 }
 0x116   : > { %v525_v25 = vpop.f32.mrb[1].mxu0 }
 0x117   : > { %v1283_v26 = vpop.f32.mrb[2].mxu0 }
 0x118   : > { %v589_v27 = vpack.c.bf16 %v1283_v26, %v1282_v24  ;;  %v528_v28 = vpop.f32.mrb[3].mxu0 }
 0x119   : > { %v588_v29 = vpack.c.bf16 %v528_v28, %v525_v25 }
 0x11b   : > { %1312 = vmatprep.mubr.bf16.mxu1 %v588_v29 }
 0x11c   : > { %1313 = vmatmul.mubr.bf16.vlgmr.msra.gmra.mrb[0].mxu1 %v589_v27 }
 0x11d   : > { %v1286_v30 = vpop.f32.mrb[4].mxu0 }
 0x11e   : > { %v541_v31 = vpop.f32.mrb[5].mxu0 }
 0x11f   : > { %v1287_v32 = vpop.f32.mrb[6].mxu0 }
 0x120   : > { %v591_v33 = vpack.c.bf16 %v1287_v32, %v1286_v30  ;;  %v544_v34 = vpop.f32.mrb[7].mxu0 }
 0x121   : > { %v590_v35 = vpack.c.bf16 %v544_v34, %v541_v31 }
 0x123   : > { %1316 = vmatprep.mubr.bf16.mxu1 %v590_v35 }
 0x124   : > { %1317 = vmatmul.mubr.bf16.gmra.mrb[4].mxu1 %v591_v33  ;;  %v859_v33 = vlaneseq }
 0x125   : > { %v1290_v36 = vpop.f32.mrb[8].mxu0 }
 0x126   : > { %v557_v37 = vpop.f32.mrb[9].mxu0 }
 0x127   : > { %v1291_v38 = vpop.f32.mrb[10].mxu0 }
 0x128   : > { %v593_v39 = vpack.c.bf16 %v1291_v38, %v1290_v36  ;;  %v560_v40 = vpop.f32.mrb[11].mxu0 }
 0x129   : > { %v592_v41 = vpack.c.bf16 %v560_v40, %v557_v37  ;;  %v1636_v37 = vshrl.u32 %v859_v33, 7 }
 0x12b   : > { %1320 = vmatprep.mubr.bf16.mxu1 %v592_v41 }
 0x12c   : > { %1321 = vmatmul.mubr.bf16.gmra.mrb[8].mxu1 %v593_v39 }
 0x12d   : > { %v1294_v42 = vpop.f32.mrb[12].mxu0 }
 0x12e   : > { %v573_v43 = vpop.f32.mrb[13].mxu0 }
 0x12f   : > { %v1295_v44 = vpop.f32.mrb[14].mxu0 }
 0x130   : > { %v595_v45 = vpack.c.bf16 %v1295_v44, %v1294_v42  ;;  %v576_v46 = vpop.f32.mrb[15].mxu0  ;;  %v862_v42 = vadd.s32 16, %v1636_v37  ;;  %v1639_v44 = vstv %s894_s16 }
 0x131   : > { %v594_v47 = vpack.c.bf16 %v576_v46, %v573_v43  ;;  %v861_v46 = vadd.s32 8, %v1636_v37  ;;  %vm896_vm1 = vcmp.lt.s32.totalorder %v1636_v37, %v1639_v44 }
 0x132   : > { %vm898_vm0 = vcmp.lt.s32.totalorder %v862_v42, %v1639_v44 }
 0x133   : > { %1324 = vmatprep.mubr.bf16.mxu1 %v594_v47  ;;  %vm897_vm3 = vcmp.lt.s32.totalorder %v861_v46, %v1639_v44 }
 0x134   : > { %1325 = vmatmul.mubr.bf16.gmra.mrb[12].mxu1 %v595_v45  ;;  %v863_v45 = vadd.s32 24, %v1636_v37 }
 0x136   : > { %vm899_vm2 = vcmp.lt.s32.totalorder %v863_v45, %v1639_v44 }
 0x1ef   : > { %v1314_v49 = vpop.f32.mrb[0].mxu1 }
 0x1f0   : > { %v1571_v50 = vadd.f32 %v1314_v49, %v1202_v48  ;;  %v684_v51 = vpop.f32.mrb[1].mxu1  ;;  %v864_v49 = vadd.s32 32, %v1636_v37 }
 0x1f1   : > { %v1573_v52 = vadd.f32 %v1202_v48, %v684_v51  ;;  %v1315_v53 = vpop.f32.mrb[2].mxu1 }
 0x1f2   : > { %v1575_v54 = vadd.f32 %v1315_v53, %v1202_v48  ;;  %v687_v55 = vpop.f32.mrb[3].mxu1  ;;  %v749_v56 = vmul.f32 %v1571_v50, %v1571_v50  ;;  %v865_v53 = vadd.s32 40, %v1636_v37  ;;  %vm900_vm4 = vcmp.lt.s32.totalorder %v864_v49, %v1639_v44 }
 0x1f3   : > { %v1579_v57 = vadd.f32 %v1202_v48, %v687_v55  ;;  %v747_v58 = vmul.f32 %v1573_v52, %v1573_v52 }
 0x1f4   : > { %767 = vadd.xlane.f32.xlu1 %v749_v56  ;;  %v750_v59 = vmul.f32 %v1575_v54, %v1575_v54  ;;  %v866_v56 = vadd.s32 48, %v1636_v37  ;;  %vm901_vm5 = vcmp.lt.s32.totalorder %v865_v53, %v1639_v44 }
 0x1f5   : > { %763 = vadd.xlane.f32.xlu0 %v747_v58  ;;  %v748_v61 = vmul.f32 %v1579_v57, %v1579_v57 }
 0x1f6   : > { %vm902_vm6 = vcmp.lt.s32.totalorder %v866_v56, %v1639_v44 }
 0x1f7   : > { %v1318_v60 = vpop.f32.mrb[4].mxu1 }
 0x1f8   : > { %769 = vadd.xlane.f32.xlu1 %v750_v59  ;;  %v700_v62 = vpop.f32.mrb[5].mxu1  ;;  %v1589_v2 = vadd.f32 %v1318_v60, %v1202_v48  ;;  %v1449_v59 = vmov 0.0  }
 0x1f9   : > { %v1587_v63 = vadd.f32 %v1202_v48, %v700_v62  ;;  %765 = vadd.xlane.f32.xlu0 %v748_v61  ;;  %v1319_v0 = vpop.f32.mrb[6].mxu1  ;;  %v1213_v60 = vsel %vm898_vm0, 1.0, %v1449_v59  ;;  %v867_v62 = vadd.s32 56, %v1636_v37 }
 0x1fa   : > { %v703_v1 = vpop.f32.mrb[7].mxu1  ;;  %v1595_v5 = vadd.f32 %v1319_v0, %v1202_v48  ;;  %v753_v8 = vmul.f32 %v1589_v2, %v1589_v2  ;;  %v868_v0 = vadd.s32 64, %v1636_v37 }
 0x1fb   : > { %v1591_v3 = vadd.f32 %v1202_v48, %v703_v1  ;;  %v751_v4 = vmul.f32 %v1587_v63, %v1587_v63  ;;  %vm903_vm7 = vcmp.lt.s32.totalorder %v867_v62, %v1639_v44 }
 0x1fc   : > { %v754_v12 = vmul.f32 %v1595_v5, %v1595_v5  ;;  %vm904_vm8 = vcmp.lt.s32.totalorder %v868_v0, %v1639_v44 }
 0x1fd   : > { %771 = vadd.xlane.f32.xlu0 %v751_v4  ;;  %v752_v6 = vmul.f32 %v1591_v3, %v1591_v3 }
 0x1ff   : > { %773 = vadd.xlane.f32.xlu1 %v752_v6  ;;  %v1322_v7 = vpop.f32.mrb[8].mxu1  ;;  %v1211_v6 = vsel %vm896_vm1, 1.0, %v1449_v59 }
 0x200   : > { %v716_v9 = vpop.f32.mrb[9].mxu1  ;;  %v1605_v14 = vadd.f32 %v1322_v7, %v1202_v48 }
 0x201   : > { %v1601_v10 = vadd.f32 %v1202_v48, %v716_v9  ;;  %775 = vadd.xlane.f32.xlu0 %v753_v8  ;;  %v1323_v11 = vpop.f32.mrb[10].mxu1  ;;  %v1214_v9 = vsel %vm899_vm2, 1.0, %v1449_v59 }
 0x202   : > { %v719_v13 = vpop.f32.mrb[11].mxu1  ;;  %v1611_v17 = vadd.f32 %v1323_v11, %v1202_v48  ;;  %v757_v20 = vmul.f32 %v1605_v14, %v1605_v14  ;;  %v1212_v11 = vsel %vm897_vm3, 1.0, %v1449_v59 }
 0x203   : > { %v1607_v15 = vadd.f32 %v1202_v48, %v719_v13  ;;  %777 = vadd.xlane.f32.xlu1 %v754_v12  ;;  %v755_v16 = vmul.f32 %v1601_v10, %v1601_v10 }
 0x204   : > { %v758_v24 = vmul.f32 %v1611_v17, %v1611_v17 }
 0x205   : > { %779 = vadd.xlane.f32.xlu0 %v755_v16  ;;  %v756_v18 = vmul.f32 %v1607_v15, %v1607_v15  ;;  %v869_v16 = vadd.s32 72, %v1636_v37 }
 0x207   : > { %781 = vadd.xlane.f32.xlu1 %v756_v18  ;;  %v1326_v19 = vpop.f32.mrb[12].mxu1  ;;  %v870_v18 = vadd.s32 80, %v1636_v37  ;;  %vm905_vm9 = vcmp.lt.s32.totalorder %v869_v16, %v1639_v44 }
 0x208   : > { %v732_v21 = vpop.f32.mrb[13].mxu1  ;;  %v1621_v26 = vadd.f32 %v1326_v19, %v1202_v48  ;;  %v1707_v49 = vsel %vm905_vm9, 1.0, %v1449_v59 }
 0x209   : > { %v1617_v22 = vadd.f32 %v1202_v48, %v732_v21  ;;  %783 = vadd.xlane.f32.xlu0 %v757_v20  ;;  %v1327_v23 = vpop.f32.mrb[14].mxu1  ;;  %vm906_vm10 = vcmp.lt.s32.totalorder %v870_v18, %v1639_v44 }
 0x20a   : > { %v735_v25 = vpop.f32.mrb[15].mxu1  ;;  %v1627_v29 = vadd.f32 %v1327_v23, %v1202_v48  ;;  %v761_v31 = vmul.f32 %v1621_v26, %v1621_v26 }
 0x20b   : > { %v1623_v27 = vadd.f32 %v1202_v48, %v735_v25  ;;  %785 = vadd.xlane.f32.xlu1 %v758_v24  ;;  %v759_v28 = vmul.f32 %v1617_v22, %v1617_v22  ;;  %v1215_v25 = vsel %vm900_vm4, 1.0, %v1449_v59 }
 0x20c   : > { %v762_v32 = vmul.f32 %v1627_v29, %v1627_v29 }
 0x20d   : > { %787 = vadd.xlane.f32.xlu0 %v759_v28  ;;  %v760_v30 = vmul.f32 %v1623_v27, %v1623_v27  ;;  %v1216_v28 = vsel %vm901_vm5, 1.0, %v1449_v59 }
 0x20f   : > { %789 = vadd.xlane.f32.xlu1 %v760_v30  ;;  %v1217_v30 = vsel %vm902_vm6, 1.0, %v1449_v59 }
 0x211   : > { %791 = vadd.xlane.f32.xlu0 %v761_v31 }
 0x213   : > { %793 = vadd.xlane.f32.xlu1 %v762_v32 }
 0x281   : > { %v768_v34 = vpop.xlane.xlu1 %767 }
 0x282   : > { %v797_v35 = vmax.f32 %v768_v34, 1e-24  ;;  %v764_v36 = vpop.xlane.xlu0 %763  ;;  %v1700_v34 = vsel %vm904_vm8, 1.0, %v1449_v59 }
 0x283   : > { %v795_v38 = vmax.f32 %v764_v36, 1e-24 }
 0x284   : > { %1378 = vrsqrt.f32 %v797_v35 }
 0x285   : > { %1380 = vrsqrt.f32 %v795_v38  ;;  %v770_v39 = vpop.xlane.xlu1 %769 }
 0x286   : > { %v798_v40 = vmax.f32 %v770_v39, 1e-24  ;;  %v766_v41 = vpop.xlane.xlu0 %765 }
 0x287   : > { %v796_v43 = vmax.f32 %v766_v41, 1e-24 }
 0x288   : > { %1382 = vrsqrt.f32 %v798_v40  ;;  %v871_v40 = vadd.s32 88, %v1636_v37 }
 0x289   : > { %1384 = vrsqrt.f32 %v796_v43 }
 0x28a   : > { %v772_v47 = vpop.xlane.xlu0 %771  ;;  %vm907_vm11 = vcmp.lt.s32.totalorder %v871_v40, %v1639_v44 }
 0x28b   : > { %v799_v48 = vmax.f32 %v772_v47, 1e-24 }
 0x28c   : > { %v774_v51 = vpop.xlane.xlu1 %773 }
 0x28d   : > { %1386 = vrsqrt.f32 %v799_v48  ;;  %v800_v55 = vmax.f32 %v774_v51, 1e-24 }
 0x28e   : > { %v1379_v58 = vpop.eup %1378  ;;  %v776_v61 = vpop.xlane.xlu0 %775 }
 0x28f   : > { %v1381_v1 = vpop.eup %1380  ;;  %v829_v4 = vmul.f32 %v1379_v58, %v1571_v50  ;;  %1388 = vrsqrt.f32 %v800_v55  ;;  %v801_v7 = vmax.f32 %v776_v61, 1e-24 }
 0x290   : > { %v827_v8 = vmul.f32 %v1381_v1, %v1573_v52  ;;  %v778_v50 = vpop.xlane.xlu1 %777 }
 0x291   : > { %845 = vst [vmem:[%s1655_s19 + $0x10] sm:$0xff] %v829_v4  ;;  %1390 = vrsqrt.f32 %v801_v7  ;;  %v802_v12 = vmax.f32 %v778_v50, 1e-24  ;;  %v946_v32 = vmul.f32 %v1213_v60, %v829_v4 }
 0x292   : > { %v1383_v13 = vpop.eup %1382  ;;  %843 = vst [vmem:[%s1655_s19] sm:$0xff] %v827_v8  ;;  %v780_v52 = vpop.xlane.xlu0 %779  ;;  %v944_v20 = vmul.f32 %v1211_v6, %v827_v8 }
 0x293   : > { %v1385_v19 = vpop.eup %1384  ;;  %v830_v21 = vmul.f32 %v1383_v13, %v1575_v54  ;;  %1392 = vrsqrt.f32 %v802_v12  ;;  %v803_v23 = vmax.f32 %v780_v52, 1e-24  ;;  %v1218_v54 = vsel %vm903_vm7, 1.0, %v1449_v59 }
 0x294   : > { %v828_v24 = vmul.f32 %v1385_v19, %v1579_v57  ;;  %v782_v31 = vpop.xlane.xlu1 %781  ;;  %v979_v38 = vmul.f32 %v944_v20, %v944_v20  ;;  %v981_v48 = vmul.f32 %v946_v32, %v946_v32 }
 0x295   : > { %846 = vst [vmem:[%s1655_s19 + $0x18] sm:$0xff] %v830_v21  ;;  %1394 = vrsqrt.f32 %v803_v23  ;;  %v804_v57 = vmax.f32 %v782_v31, 1e-24  ;;  %v947_v41 = vmul.f32 %v1214_v9, %v830_v21  ;;  %v872_v9 = vadd.s32 96, %v1636_v37 }
 0x296   : > { %844 = vst [vmem:[%s1655_s19 + $0x8] sm:$0xff] %v828_v24  ;;  %v945_v33 = vmul.f32 %v1212_v11, %v828_v24  ;;  %v784_v35 = vpop.xlane.xlu0 %783 }
 0x297   : > { %v1387_v36 = vpop.eup %1386  ;;  %1396 = vrsqrt.f32 %v804_v57  ;;  %v805_v39 = vmax.f32 %v784_v35, 1e-24  ;;  %v982_v0 = vmul.f32 %v947_v41, %v947_v41  ;;  %vm908_vm12 = vcmp.lt.s32.totalorder %v872_v9, %v1639_v44 }
 0x298   : > { %v961_v42 = vadd.f32 %v945_v33, %v944_v20  ;;  %v980_v43 = vmul.f32 %v945_v33, %v945_v33  ;;  %v831_v45 = vmul.f32 %v1387_v36, %v1587_v63  ;;  %v786_v46 = vpop.xlane.xlu1 %785  ;;  %v1221_v63 = vsel %vm906_vm10, 1.0, %v1449_v59 }
 0x299   : > { %v1389_v47 = vpop.eup %1388  ;;  %1398 = vrsqrt.f32 %v805_v39  ;;  %v806_v51 = vmax.f32 %v786_v46, 1e-24 }
 0x29a   : > { %v962_v53 = vadd.f32 %v961_v42, %v946_v32  ;;  %v995_v55 = vadd.f32 %v980_v43, %v979_v38  ;;  %847 = vst [vmem:[%s1655_s19 + $0x20] sm:$0xff] %v831_v45  ;;  %v948_v56 = vmul.f32 %v1215_v25, %v831_v45  ;;  %v832_v58 = vmul.f32 %v1389_v47, %v1591_v3  ;;  %v788_v60 = vpop.xlane.xlu0 %787 }
 0x29b   : > { %v1391_v61 = vpop.eup %1390  ;;  %1400 = vrsqrt.f32 %v806_v51  ;;  %v807_v62 = vmax.f32 %v788_v60, 1e-24  ;;  %v873_v32 = vadd.s32 104, %v1636_v37  ;;  %v874_v38 = vadd.s32 112, %v1636_v37 }
 0x29c   : > { %v996_v1 = vadd.f32 %v995_v55, %v981_v48  ;;  %v963_v4 = vadd.f32 %v962_v53, %v947_v41  ;;  %848 = vst [vmem:[%s1655_s19 + $0x28] sm:$0xff] %v832_v58  ;;  %v949_v6 = vmul.f32 %v1216_v28, %v832_v58  ;;  %v790_v7 = vpop.xlane.xlu1 %789  ;;  %v833_v3 = vmul.f32 %v1391_v61, %v1589_v2 }
 0x29d   : > { %v1393_v8 = vpop.eup %1392  ;;  %1402 = vrsqrt.f32 %v807_v62  ;;  %v808_v11 = vmax.f32 %v790_v7, 1e-24  ;;  %v983_v13 = vmul.f32 %v948_v56, %v948_v56  ;;  %vm909_vm13 = vcmp.lt.s32.totalorder %v873_v32, %v1639_v44 }
 0x29e   : > { %v997_v50 = vadd.f32 %v996_v1, %v982_v0  ;;  %v964_v12 = vadd.f32 %v963_v4, %v948_v56  ;;  %v834_v52 = vmul.f32 %v1393_v8, %v1595_v5  ;;  %v792_v16 = vpop.xlane.xlu0 %791  ;;  %v984_v19 = vmul.f32 %v949_v6, %v949_v6  ;;  %849 = vst [vmem:[%s1655_s19 + $0x30] sm:$0xff] %v833_v3 }
 0x29f   : > { %v1395_v18 = vpop.eup %1394  ;;  %v950_v20 = vmul.f32 %v1217_v30, %v833_v3  ;;  %1404 = vrsqrt.f32 %v808_v11  ;;  %v809_v21 = vmax.f32 %v792_v16, 1e-24  ;;  %v1222_v5 = vsel %vm907_vm11, 1.0, %v1449_v59 }
 0x2a0   : > { %v998_v23 = vadd.f32 %v997_v50, %v983_v13  ;;  %v965_v2 = vadd.f32 %v964_v12, %v949_v6  ;;  %850 = vst [vmem:[%s1655_s19 + $0x38] sm:$0xff] %v834_v52  ;;  %v951_v24 = vmul.f32 %v1218_v54, %v834_v52  ;;  %v835_v25 = vmul.f32 %v1395_v18, %v1601_v10  ;;  %v794_v28 = vpop.xlane.xlu1 %793 }
 0x2a1   : > { %v1397_v31 = vpop.eup %1396  ;;  %1406 = vrsqrt.f32 %v809_v21  ;;  %v810_v57 = vmax.f32 %v794_v28, 1e-24  ;;  %v985_v35 = vmul.f32 %v950_v20, %v950_v20  ;;  %vm910_vm14 = vcmp.lt.s32.totalorder %v874_v38, %v1639_v44 }
 0x2a2   : > { %v999_v30 = vadd.f32 %v998_v23, %v984_v19  ;;  %v966_v33 = vadd.f32 %v965_v2, %v950_v20  ;;  %851 = vst [vmem:[%s1655_s19 + $0x40] sm:$0xff] %v835_v25  ;;  %v952_v36 = vmul.f32 %v1700_v34, %v835_v25  ;;  %v836_v10 = vmul.f32 %v1397_v31, %v1607_v15 }
 0x2a3   : > { %v1399_v54 = vpop.eup %1398  ;;  %1408 = vrsqrt.f32 %v810_v57  ;;  %v986_v41 = vmul.f32 %v951_v24, %v951_v24  ;;  %v875_v15 = vadd.s32 120, %v1636_v37 }
 0x2a4   : > { %v1000_v39 = vadd.f32 %v999_v30, %v985_v35  ;;  %v967_v40 = vadd.f32 %v966_v33, %v951_v24  ;;  %v837_v42 = vmul.f32 %v1399_v54, %v1605_v14  ;;  %v987_v45 = vmul.f32 %v952_v36, %v952_v36  ;;  %852 = vst [vmem:[%s1655_s19 + $0x48] sm:$0xff] %v836_v10 }
 0x2a5   : > { %v1401_v43 = vpop.eup %1400  ;;  %v953_v34 = vmul.f32 %v1707_v49, %v836_v10  ;;  %v1223_v14 = vsel %vm908_vm12, 1.0, %v1449_v59  ;;  %vm911_vm15 = vcmp.lt.s32.totalorder %v875_v15, %v1639_v44 }
 0x2a6   : > { %v1001_v46 = vadd.f32 %v1000_v39, %v986_v41  ;;  %v968_v47 = vadd.f32 %v967_v40, %v952_v36  ;;  %853 = vst [vmem:[%s1655_s19 + $0x50] sm:$0xff] %v837_v42  ;;  %v954_v48 = vmul.f32 %v1221_v63, %v837_v42  ;;  %v838_v51 = vmul.f32 %v1401_v43, %v1611_v17 }
 0x2a7   : > { %v1403_v53 = vpop.eup %1402  ;;  %v988_v56 = vmul.f32 %v953_v34, %v953_v34  ;;  %v1224_v17 = vsel %vm909_vm13, 1.0, %v1449_v59 }
 0x2a8   : > { %v1002_v55 = vadd.f32 %v1001_v46, %v987_v45  ;;  %v969_v49 = vadd.f32 %v968_v47, %v953_v34  ;;  %854 = vst [vmem:[%s1655_s19 + $0x58] sm:$0xff] %v838_v51  ;;  %v955_v58 = vmul.f32 %v1222_v5, %v838_v51  ;;  %v839_v60 = vmul.f32 %v1403_v53, %v1617_v22 }
 0x2a9   : > { %v1405_v37 = vpop.eup %1404  ;;  %v989_v62 = vmul.f32 %v954_v48, %v954_v48  ;;  %v1225_v22 = vsel %vm910_vm14, 1.0, %v1449_v59 }
 0x2aa   : > { %v1003_v61 = vadd.f32 %v1002_v55, %v988_v56  ;;  %v970_v63 = vadd.f32 %v969_v49, %v954_v48  ;;  %v840_v0 = vmul.f32 %v1405_v37, %v1623_v27  ;;  %v990_v4 = vmul.f32 %v955_v58, %v955_v58  ;;  %855 = vst [vmem:[%s1655_s19 + $0x60] sm:$0xff] %v839_v60 }
 0x2ab   : > { %v1407_v1 = vpop.eup %1406  ;;  %v956_v6 = vmul.f32 %v1223_v14, %v839_v60  ;;  %v1226_v27 = vsel %vm911_vm15, 1.0, %v1449_v59 }
 0x2ac   : > { %v1004_v7 = vadd.f32 %v1003_v61, %v989_v62  ;;  %v971_v8 = vadd.f32 %v970_v63, %v955_v58  ;;  %856 = vst [vmem:[%s1655_s19 + $0x68] sm:$0xff] %v840_v0  ;;  %v957_v3 = vmul.f32 %v1224_v17, %v840_v0  ;;  %v841_v9 = vmul.f32 %v1407_v1, %v1621_v26 }
 0x2ad   : > { %v1409_v11 = vpop.eup %1408  ;;  %v991_v13 = vmul.f32 %v956_v6, %v956_v6 }
 0x2ae   : > { %v1005_v50 = vadd.f32 %v1004_v7, %v990_v4  ;;  %v972_v12 = vadd.f32 %v971_v8, %v956_v6  ;;  %857 = vst [vmem:[%s1655_s19 + $0x70] sm:$0xff] %v841_v9  ;;  %v958_v52 = vmul.f32 %v1225_v22, %v841_v9  ;;  %v842_v16 = vmul.f32 %v1409_v11, %v1627_v29 }
 0x2af   : > { %v992_v20 = vmul.f32 %v957_v3, %v957_v3 }
 0x2b0   : > { %v1006_v18 = vadd.f32 %v1005_v50, %v991_v13  ;;  %v973_v19 = vadd.f32 %v972_v12, %v957_v3  ;;  %858 = vst [vmem:[%s1655_s19 + $0x78] sm:$0xff] %v842_v16  ;;  %v959_v21 = vmul.f32 %v1226_v27, %v842_v16  ;;  %v993_v2 = vmul.f32 %v958_v52, %v958_v52 }
 0x2b2   : > { %v1007_v23 = vadd.f32 %v1006_v18, %v992_v20  ;;  %v974_v26 = vadd.f32 %v973_v19, %v958_v52  ;;  %v994_v25 = vmul.f32 %v959_v21, %v959_v21 }
 0x2b4   : > { %v1008_v24 = vadd.f32 %v1007_v23, %v993_v2  ;;  %v975_v44 = vadd.f32 %v974_v26, %v959_v21 }
 0x2b6   : > { %v1009_v59 = vadd.f32 %v1008_v24, %v994_v25  ;;  %977 = vst [vmem:[%s334_s23] sm:$0xff] %v975_v44 }
 0x2b8   : > { %1011 = vst [vmem:[%s338_s26] sm:$0xff] %v1009_v59 }
 0x2b9 PF: > { %s24_s8 = sadd.s32 1, %s1446_s8   ;;  %s1785_s29 = smov %s1442_s30 }
 0x2ba   : > { %p21_p10 = scmp.ge.s32.totalorder %s24_s8, 4   ;;  %s1786_s30 = smov %s1788_s0 }
 0x2bc   :  { %23 = sbr.rel (!%p21_p10) target bundleno = 17 (0x11), region = 97 }

</bundles_post_ra>
